<compile_context>
chip_gen: v7x
topology: tpu7x:2x2x1
jax: 0.10.0
libtpu: 0.0.40
codegen_flags: <defaults>
</compile_context>

<pallas_src>
import math
from functools import partial

import numpy as np
import jax
import jax.numpy as jnp
from jax.experimental import pallas as pl
from jax.experimental.pallas import tpu as pltpu


# ---------------------------------------------------------------------------
# Small helpers
# ---------------------------------------------------------------------------
def _round_up(x, m):
    return ((x + m - 1) // m) * m


def _tile(dim, unit, cap):
    """Pick a tile size (multiple of `unit`, <= cap) and the padded dim."""
    dim_u = _round_up(dim, unit)
    if dim_u <= cap:
        return dim_u, dim_u
    best_t, best_p = cap, _round_up(dim, cap)
    for t in range(cap, unit - 1, -unit):
        p = _round_up(dim, t)
        if p < best_p:
            best_t, best_p = t, p
    return best_t, best_p


# ---------------------------------------------------------------------------
# Pallas kernels
# ---------------------------------------------------------------------------
def _make_mm_kernel(relu, has_res):
    """Tiled matmul with fused epilogue: out = [relu]( A@B + bias [+ res] ).

    Grid is (M_tiles, N_tiles, K_tiles); the f32 output block is revisited
    across the K axis and doubles as the accumulator (no scratch)."""

    def kernel(*refs):
        if has_res:
            a_ref, b_ref, bias_ref, res_ref, o_ref = refs
        else:
            a_ref, b_ref, bias_ref, o_ref = refs
            res_ref = None

        k = pl.program_id(2)

        @pl.when(k == 0)
        def _init():
            o_ref[...] = jnp.zeros_like(o_ref)

        o_ref[...] += jnp.dot(a_ref[...], b_ref[...],
                              preferred_element_type=jnp.float32)

        @pl.when(k == pl.num_programs(2) - 1)
        def _epilogue():
            y = o_ref[...] + bias_ref[...]
            if has_res:
                y = y + res_ref[...]
            if relu:
                y = jnp.maximum(y, 0.0)
            o_ref[...] = y

    return kernel


def _scale_bias_relu_kernel(x_ref, s_ref, b_ref, o_ref):
    """Fused inference BatchNorm (y = x*scale + bias) + ReLU."""
    o_ref[...] = jnp.maximum(x_ref[...] * s_ref[...] + b_ref[...], 0.0)


def _max9_kernel(*refs):
    """Single-pass elementwise max over the 9 maxpool taps."""
    o_ref = refs[-1]
    y = refs[0][...]
    for r in refs[1:-1]:
        y = jnp.maximum(y, r[...])
    o_ref[...] = y


# ---------------------------------------------------------------------------
# Fused tiled matmul wrapper (used by every conv and by the upsampler)
# ---------------------------------------------------------------------------
def fused_matmul(a, b, bias, *, residual=None, relu=False,
                 compute_dtype=jnp.bfloat16):
    """out[:m,:n] = [relu]( a @ b + bias [+ residual] )  with f32 accumulation.

    a: (M, K)  b: (K, N)  bias: (N,)  residual: (M, N) or None.
    All operands are zero-padded to tile multiples; N is padded to >=128 so
    the kernel's stores are lane-dense even when N == num_classes == 2.
    """
    m, kdim = a.shape
    kdim2, ncol = b.shape
    assert kdim == kdim2
    if residual is not None:
        assert residual.shape == (m, ncol)

    tm, mp = _tile(m, 16, 512)
    tn, npad = _tile(ncol, 128, 256)
    tk, kp = _tile(kdim, 128, 1024)

    a_p = jnp.pad(a, ((0, mp - m), (0, kp - kdim))).astype(compute_dtype)
    b_p = jnp.pad(b, ((0, kp - kdim), (0, npad - ncol))).astype(compute_dtype)
    bias_p = jnp.pad(bias.astype(jnp.float32).reshape(1, ncol),
                     ((0, 0), (0, npad - ncol)))

    operands = [a_p, b_p, bias_p]
    in_specs = [
        pl.BlockSpec((tm, tk), lambda i, j, k: (i, k)),
        pl.BlockSpec((tk, tn), lambda i, j, k: (k, j)),
        pl.BlockSpec((1, tn), lambda i, j, k: (0, j)),
    ]
    has_res = residual is not None
    if has_res:
        r_p = jnp.pad(residual.astype(jnp.float32),
                      ((0, mp - m), (0, npad - ncol)))
        operands.append(r_p)
        in_specs.append(pl.BlockSpec((tm, tn), lambda i, j, k: (i, j)))

    out = pl.pallas_call(
        _make_mm_kernel(relu=relu, has_res=has_res),
        out_shape=jax.ShapeDtypeStruct((mp, npad), jnp.float32),
        grid_spec=pltpu.PrefetchScalarGridSpec(
            num_scalar_prefetch=0,
            grid=(mp // tm, npad // tn, kp // tk),
            in_specs=in_specs,
            out_specs=pl.BlockSpec((tm, tn), lambda i, j, k: (i, j)),
        ),
        compiler_params=pltpu.CompilerParams(
            dimension_semantics=("parallel", "parallel", "arbitrary"),
            vmem_limit_bytes=32 * 1024 * 1024,   # fits v7x's 64 MiB with room
        ),
    )(*operands)
    return out[:m, :ncol]


# ---------------------------------------------------------------------------
# Op wrappers (NHWC activations everywhere)
# ---------------------------------------------------------------------------
@partial(jax.jit, static_argnames=("stride", "pad", "relu"))
def conv2d_nhwc(x, w, b, residual=None, *, stride=1, pad=0, relu=False):
    """PyTorch-semantics Conv2d (cross-correlation) with fused bias /
    residual-add / ReLU epilogue.  x: NHWC, w: (Cout, Cin, KH, KW)."""
    n, h, wdim, cin = x.shape
    cout, _, kh, kw = w.shape
    oh = (h + 2 * pad - kh) // stride + 1
    ow = (wdim + 2 * pad - kw) // stride + 1

    if kh == 1 and kw == 1 and pad == 0:
        patches = x[:, ::stride, ::stride, :].reshape(n * oh * ow, cin)
    else:
        xp = jnp.pad(x, ((0, 0), (pad, pad), (pad, pad), (0, 0)))
        cols = []
        for i in range(kh):
            for j in range(kw):
                cols.append(xp[:, i:i + stride * oh:stride,
                               j:j + stride * ow:stride, :])
        patches = jnp.concatenate(cols, axis=-1).reshape(n * oh * ow,
                                                         kh * kw * cin)

    wmat = jnp.transpose(w, (2, 3, 1, 0)).reshape(kh * kw * cin, cout)
    res = None if residual is None else residual.reshape(n * oh * ow, cout)
    out = fused_matmul(patches, wmat, b, residual=res, relu=relu,
                       compute_dtype=jnp.bfloat16)
    return out.reshape(n, oh, ow, cout)


@jax.jit
def scale_bias_relu(x, scale, bias):
    """Standalone inference BN + ReLU (only needed inside Refine, where the BN
    precedes a conv and cannot be folded through the ReLU)."""
    n, h, w, c = x.shape
    m = n * h * w
    xf = x.reshape(m, c)
    tm, mp = _tile(m, 8, 1024)
    xp = jnp.pad(xf, ((0, mp - m), (0, 0)))
    out = pl.pallas_call(
        _scale_bias_relu_kernel,
        out_shape=jax.ShapeDtypeStruct((mp, c), jnp.float32),
        grid_spec=pltpu.PrefetchScalarGridSpec(
            num_scalar_prefetch=0,
            grid=(mp // tm,),
            in_specs=[pl.BlockSpec((tm, c), lambda i: (i, 0)),
                      pl.BlockSpec((1, c), lambda i: (0, 0)),
                      pl.BlockSpec((1, c), lambda i: (0, 0))],
            out_specs=pl.BlockSpec((tm, c), lambda i: (i, 0)),
        ),
        compiler_params=pltpu.CompilerParams(
            dimension_semantics=("parallel",)),
    )(xp, scale.reshape(1, c), bias.reshape(1, c))
    return out[:m].reshape(n, h, w, c)


@jax.jit
def maxpool_3x3_s2_p1(x):
    """3x3 / stride-2 / pad-1 max pool, NHWC, single fused 9-way max kernel."""
    n, h, w, c = x.shape
    oh = (h + 2 - 3) // 2 + 1
    ow = (w + 2 - 3) // 2 + 1
    m = n * oh * ow
    xp = jnp.pad(x, ((0, 0), (1, 1), (1, 1), (0, 0)),
                 constant_values=-jnp.inf)
    taps = [xp[:, i:i + 2 * oh:2, j:j + 2 * ow:2, :].reshape(m, c)
            for i in range(3) for j in range(3)]
    tm, mp = _tile(m, 8, 1024)
    taps = [jnp.pad(t, ((0, mp - m), (0, 0))) for t in taps]
    out = pl.pallas_call(
        _max9_kernel,
        out_shape=jax.ShapeDtypeStruct((mp, c), jnp.float32),
        grid_spec=pltpu.PrefetchScalarGridSpec(
            num_scalar_prefetch=0,
            grid=(mp // tm,),
            in_specs=[pl.BlockSpec((tm, c), lambda i: (i, 0))
                      for _ in range(9)],
            out_specs=pl.BlockSpec((tm, c), lambda i: (i, 0)),
        ),
        compiler_params=pltpu.CompilerParams(
            dimension_semantics=("parallel",)),
    )(*taps)
    return out[:m].reshape(n, oh, ow, c)


def _interp_matrix(out_size, in_size):
    """Bilinear weights, align_corners=True (== F.upsample_bilinear)."""
    a = np.zeros((out_size, in_size), np.float32)
    for i in range(out_size):
        src = 0.0 if out_size == 1 else i * (in_size - 1) / (out_size - 1)
        lo = int(math.floor(src))
        hi = min(lo + 1, in_size - 1)
        frac = src - lo
        a[i, lo] += 1.0 - frac
        a[i, hi] += frac
    return a


@partial(jax.jit, static_argnames=("out_h", "out_w"))
def upsample_bilinear_add(x, addend, *, out_h, out_w):
    """align_corners=True bilinear upsample as one lane-dense Pallas matmul:
    (N*C, IH*IW) @ kron(AH, AW).T  -> (N*C, OH*OW); optional fused `+ addend`."""
    n, ih, iw, c = x.shape
    ah = _interp_matrix(out_h, ih)
    aw = _interp_matrix(out_w, iw)
    amat = jnp.asarray(np.kron(ah, aw).T)                 # (IH*IW, OH*OW)
    xt = jnp.transpose(x, (0, 3, 1, 2)).reshape(n * c, ih * iw)
    res = None
    if addend is not None:
        res = jnp.transpose(addend, (0, 3, 1, 2)).reshape(n * c, out_h * out_w)
    bias = jnp.zeros((out_h * out_w,), jnp.float32)
    y = fused_matmul(xt, amat, bias, residual=res, relu=False,
                     compute_dtype=jnp.float32)
    return jnp.transpose(y.reshape(n, c, out_h, out_w), (0, 2, 3, 1))


# ---------------------------------------------------------------------------
# Deterministic parameter construction (synthetic weights, no checkpoint load)
# ---------------------------------------------------------------------------
class _KeyGen:
    def __init__(self, seed):
        self._base = jax.random.PRNGKey(seed)
        self._i = 0

    def __call__(self):
        self._i += 1
        return jax.random.fold_in(self._base, self._i)


def make_conv(kg, cout, cin, k, bias=False):
    fan_in = cin * k * k
    w = jax.random.normal(kg(), (cout, cin, k, k), jnp.float32) / math.sqrt(fan_in)
    b = 0.01 * jax.random.normal(kg(), (cout,), jnp.float32) if bias else None
    return {"w": w, "b": b}


def make_bn(kg, c):
    return {
        "gamma": 1.0 + 0.02 * jax.random.normal(kg(), (c,), jnp.float32),
        "beta": 0.02 * jax.random.normal(kg(), (c,), jnp.float32),
        "mean": jnp.zeros((c,), jnp.float32),
        "var": jnp.ones((c,), jnp.float32),
    }


def make_bottleneck(kg, inplanes, planes, stride, downsample):
    p = {
        "conv1": make_conv(kg, planes, inplanes, 1),
        "bn1": make_bn(kg, planes),
        "conv2": make_conv(kg, planes, planes, 3),
        "bn2": make_bn(kg, planes),
        "conv3": make_conv(kg, planes * 4, planes, 1),
        "bn3": make_bn(kg, planes * 4),
        "stride": stride,
    }
    if downsample:
        p["down_conv"] = make_conv(kg, planes * 4, inplanes, 1)
        p["down_bn"] = make_bn(kg, planes * 4)
    return p


def make_layer(kg, inplanes, planes, blocks, stride):
    layer = [make_bottleneck(kg, inplanes, planes, stride,
                             downsample=(stride != 1 or inplanes != planes * 4))]
    for _ in range(blocks - 1):
        layer.append(make_bottleneck(kg, planes * 4, planes, 1, False))
    return layer


def make_gcn(kg, inplanes, planes, ks=7):
    # nn.Conv2d(padding=ks/2) -> legacy int division -> pad = 3
    return {"conv": make_conv(kg, planes, inplanes, ks, bias=True), "pad": ks // 2}


def make_refine(kg, planes):
    return {
        "bn": make_bn(kg, planes),                 # one BN module, applied twice
        "conv1": make_conv(kg, planes, planes, 3, bias=True),
        "conv2": make_conv(kg, planes, planes, 3, bias=True),
    }


def make_ssnet(seed=42, num_classes=2):
    kg = _KeyGen(seed)
    p = {
        "conv1": make_conv(kg, 64, 3, 7),          # resnet50 stem
        "bn0": make_bn(kg, 64),
        "layer1": make_layer(kg, 64, 64, 3, 1),
        "layer2": make_layer(kg, 256, 128, 4, 2),
        "layer3": make_layer(kg, 512, 256, 6, 2),
        "layer4": make_layer(kg, 1024, 512, 3, 2),
        "gcn1": make_gcn(kg, 2048, num_classes),
        "gcn2": make_gcn(kg, 1024, num_classes),
        "gcn3": make_gcn(kg, 512, num_classes),
        "gcn4": make_gcn(kg, 256, num_classes),
        "gcn5": make_gcn(kg, 64, num_classes),     # defined but unused in forward
    }
    for i in range(1, 11):
        p[f"refine{i}"] = make_refine(kg, num_classes)
    return p


# ---------------------------------------------------------------------------
# Inference-time parameter folding (BN -> conv weights / bias; exact in eval)
# ---------------------------------------------------------------------------
def _bn_scale_bias(bn, eps=1e-5):
    inv = bn["gamma"] / jnp.sqrt(bn["var"] + eps)
    return inv, bn["beta"] - bn["mean"] * inv


def _fold_conv_bn(conv, bn, eps=1e-5):
    inv, shift = _bn_scale_bias(bn, eps)
    w = conv["w"] * inv[:, None, None, None]
    b0 = conv["b"] if conv["b"] is not None else jnp.zeros(
        (conv["w"].shape[0],), jnp.float32)
    return {"w": w, "b": b0 * inv + shift}


def _prep_bottleneck(bp):
    q = {
        "conv1": _fold_conv_bn(bp["conv1"], bp["bn1"]),
        "conv2": _fold_conv_bn(bp["conv2"], bp["bn2"]),
        "conv3": _fold_conv_bn(bp["conv3"], bp["bn3"]),
        "stride": bp["stride"],
    }
    if "down_conv" in bp:
        q["down"] = _fold_conv_bn(bp["down_conv"], bp["down_bn"])
    return q


def _prep_refine(rp):
    s, b = _bn_scale_bias(rp["bn"])
    return {"scale": s, "bias": b, "conv1": rp["conv1"], "conv2": rp["conv2"]}


def prepare_inference_params(p):
    q = {"stem": _fold_conv_bn(p["conv1"], p["bn0"])}
    for name in ("layer1", "layer2", "layer3", "layer4"):
        q[name] = [_prep_bottleneck(bp) for bp in p[name]]
    for i in range(1, 6):
        q[f"gcn{i}"] = p[f"gcn{i}"]
    for i in range(1, 11):
        q[f"refine{i}"] = _prep_refine(p[f"refine{i}"])
    return q


# ---------------------------------------------------------------------------
# Forward pass (mirrors SSNetFinal.forward)
# ---------------------------------------------------------------------------
def bottleneck_fwd(p, x):
    out = conv2d_nhwc(x, p["conv1"]["w"], p["conv1"]["b"],
                      stride=1, pad=0, relu=True)
    out = conv2d_nhwc(out, p["conv2"]["w"], p["conv2"]["b"],
                      stride=p["stride"], pad=1, relu=True)
    if "down" in p:
        identity = conv2d_nhwc(x, p["down"]["w"], p["down"]["b"],
                               stride=p["stride"], pad=0, relu=False)
    else:
        identity = x
    # conv3 + folded bn3 + residual add + ReLU, all in one kernel epilogue
    return conv2d_nhwc(out, p["conv3"]["w"], p["conv3"]["b"],
                       residual=identity, stride=1, pad=0, relu=True)


def layer_fwd(blocks, x):
    for bp in blocks:
        x = bottleneck_fwd(bp, x)
    return x


def gcn_fwd(p, x):
    return conv2d_nhwc(x, p["conv"]["w"], p["conv"]["b"],
                       stride=1, pad=p["pad"], relu=False)


def refine_fwd(p, x):
    t = scale_bias_relu(x, p["scale"], p["bias"])
    t = conv2d_nhwc(t, p["conv1"]["w"], p["conv1"]["b"],
                    stride=1, pad=1, relu=False)
    t = scale_bias_relu(t, p["scale"], p["bias"])          # same BN module again
    # conv2 + residual (the Refine input) fused into the conv epilogue
    return conv2d_nhwc(t, p["conv2"]["w"], p["conv2"]["b"],
                       residual=x, stride=1, pad=1, relu=False)


def ssnet_forward(p, x_nchw):
    # x.repeat(1, 3, 1, 1), then switch to channels-last for the whole net.
    inp = jnp.transpose(jnp.tile(x_nchw, (1, 3, 1, 1)), (0, 2, 3, 1))

    y = conv2d_nhwc(inp, p["stem"]["w"], p["stem"]["b"],
                    stride=2, pad=3, relu=True)            # conv1+bn0+relu fused
    pool = maxpool_3x3_s2_p1(y)

    fm1 = layer_fwd(p["layer1"], pool)
    fm2 = layer_fwd(p["layer2"], fm1)
    fm3 = layer_fwd(p["layer3"], fm2)
    fm4 = layer_fwd(p["layer4"], fm3)

    gcfm1 = refine_fwd(p["refine1"], gcn_fwd(p["gcn1"], fm4))
    gcfm2 = refine_fwd(p["refine2"], gcn_fwd(p["gcn2"], fm3))
    gcfm3 = refine_fwd(p["refine3"], gcn_fwd(p["gcn3"], fm2))
    gcfm4 = refine_fwd(p["refine4"], gcn_fwd(p["gcn4"], fm1))

    fs1 = refine_fwd(p["refine6"],
                     upsample_bilinear_add(gcfm1, gcfm2,
                                           out_h=fm3.shape[1], out_w=fm3.shape[2]))
    fs2 = refine_fwd(p["refine7"],
                     upsample_bilinear_add(fs1, gcfm3,
                                           out_h=fm2.shape[1], out_w=fm2.shape[2]))
    fs3 = refine_fwd(p["refine8"],
                     upsample_bilinear_add(fs2, gcfm4,
                                           out_h=fm1.shape[1], out_w=fm1.shape[2]))
    fs4 = refine_fwd(p["refine9"],
                     upsample_bilinear_add(fs3, None,
                                           out_h=pool.shape[1], out_w=pool.shape[2]))
    out = refine_fwd(p["refine10"],
                     upsample_bilinear_add(fs4, None,
                                           out_h=inp.shape[1], out_w=inp.shape[2]))
    return jnp.transpose(out, (0, 3, 1, 2))                # back to NCHW


# ---------------------------------------------------------------------------
if __name__ == "__main__":
    raw_params = make_ssnet(seed=42, num_classes=2)
    params = prepare_inference_params(raw_params)
    x = jax.random.normal(jax.random.PRNGKey(0), (1, 1, 64, 64), jnp.float32)
    out = ssnet_forward(params, x)
    out = jax.block_until_ready(out)
    assert out.shape == (1, 2, 64, 64), out.shape
    assert bool(jnp.all(jnp.isfinite(out)))
    print("KERNEL_OK")
</pallas_src>

<mosaic_0001>
module attributes {stable_mosaic.version = 11 : i64} {
  func.func @kernel(%arg0: i32, %arg1: i32, %arg2: i32, %arg3: memref<512x256xbf16, #tpu.memory_space<vmem>>, %arg4: memref<256x128xbf16, #tpu.memory_space<vmem>>, %arg5: memref<1x128xf32, #tpu.memory_space<vmem>>, %arg6: memref<512x128xf32, #tpu.memory_space<vmem>>) attributes {dimension_semantics = [#tpu.dimension_semantics<parallel>, #tpu.dimension_semantics<parallel>, #tpu.dimension_semantics<arbitrary>], iteration_bounds = array<i64: 2, 1, 1>, scalar_prefetch = 0 : i64, scratch_operands = 0 : i64, tpu.core_type = #tpu.core_type<tc>, window_params = [{transform_indices = @transform_0, window_bounds = array<i64: 512, 256>}, {transform_indices = @transform_1, window_bounds = array<i64: 256, 128>}, {transform_indices = @transform_2, window_bounds = array<i64: 1, 128>}, {transform_indices = @transform_3, window_bounds = array<i64: 512, 128>}]} {
    %c0_i32 = arith.constant 0 : i32
    %0 = arith.cmpi eq, %arg2, %c0_i32 : i32
    %1 = arith.extui %0 : i1 to i32
    %c0_i32_0 = arith.constant 0 : i32
    %2 = arith.cmpi ne, %1, %c0_i32_0 : i32
    scf.if %2 {
      %cst_10 = arith.constant 0.000000e+00 : f32
      %12 = vector.broadcast %cst_10 : f32 to vector<512x128xf32>
      %c0_11 = arith.constant 0 : index
      %c0_12 = arith.constant 0 : index
      %13 = vector.load %arg6[%c0_11, %c0_12] : memref<512x128xf32, #tpu.memory_space<vmem>>, vector<512x128xf32>
      tpu.vector_store %arg6[%c0_11, %c0_12], %12 {strides = array<i32>} : memref<512x128xf32, #tpu.memory_space<vmem>>, vector<512x128xf32>,
    } else {
    }
    %c0 = arith.constant 0 : index
    %c0_1 = arith.constant 0 : index
    %3 = vector.load %arg6[%c0, %c0_1] : memref<512x128xf32, #tpu.memory_space<vmem>>, vector<512x128xf32>
    %c0_2 = arith.constant 0 : index
    %c0_3 = arith.constant 0 : index
    %4 = vector.load %arg3[%c0_2, %c0_3] : memref<512x256xbf16, #tpu.memory_space<vmem>>, vector<512x256xbf16>
    %c0_4 = arith.constant 0 : index
    %c0_5 = arith.constant 0 : index
    %5 = vector.load %arg4[%c0_4, %c0_5] : memref<256x128xbf16, #tpu.memory_space<vmem>>, vector<256x128xbf16>
    %cst = arith.constant dense<0.000000e+00> : vector<512x128xf32>
    %6 = tpu.matmul %4, %5, %cst {dimension_numbers = #tpu.dot_dimension_numbers<[1], [0], [0], [1], [0, 0, 1, 1], [], []>} : vector<512x256xbf16>, vector<256x128xbf16>, vector<512x128xf32> -> vector<512x128xf32>
    %7 = arith.addf %3, %6 : vector<512x128xf32>
    %c0_6 = arith.constant 0 : index
    %c0_7 = arith.constant 0 : index
    %8 = vector.load %arg6[%c0_6, %c0_7] : memref<512x128xf32, #tpu.memory_space<vmem>>, vector<512x128xf32>
    tpu.vector_store %arg6[%c0_6, %c0_7], %7 {strides = array<i32>} : memref<512x128xf32, #tpu.memory_space<vmem>>, vector<512x128xf32>,
    %c0_i32_8 = arith.constant 0 : i32
    %9 = arith.cmpi eq, %arg2, %c0_i32_8 : i32
    %10 = arith.extui %9 : i1 to i32
    %c0_i32_9 = arith.constant 0 : i32
    %11 = arith.cmpi ne, %10, %c0_i32_9 : i32
    scf.if %11 {
      %c0_10 = arith.constant 0 : index
      %c0_11 = arith.constant 0 : index
      %12 = vector.load %arg6[%c0_10, %c0_11] : memref<512x128xf32, #tpu.memory_space<vmem>>, vector<512x128xf32>
      %c0_12 = arith.constant 0 : index
      %c0_13 = arith.constant 0 : index
      %13 = vector.load %arg5[%c0_12, %c0_13] : memref<1x128xf32, #tpu.memory_space<vmem>>, vector<1x128xf32>
      %14 = vector.broadcast %13 : vector<1x128xf32> to vector<512x128xf32>
      %15 = arith.addf %12, %14 : vector<512x128xf32>
      %cst_14 = arith.constant 0.000000e+00 : f32
      %16 = vector.broadcast %cst_14 : f32 to vector<512x128xf32>
      %17 = arith.maximumf %15, %16 : vector<512x128xf32>
      %c0_15 = arith.constant 0 : index
      %c0_16 = arith.constant 0 : index
      %18 = vector.load %arg6[%c0_15, %c0_16] : memref<512x128xf32, #tpu.memory_space<vmem>>, vector<512x128xf32>
      tpu.vector_store %arg6[%c0_15, %c0_16], %17 {strides = array<i32>} : memref<512x128xf32, #tpu.memory_space<vmem>>, vector<512x128xf32>,
    } else {
    }
    return
  }
  func.func @transform_0(%arg0: i32, %arg1: i32, %arg2: i32) -> (i32, i32) {
    %c0_i32 = arith.constant 0 : i32
    return %arg0, %arg2 : i32, i32
  }
  func.func @transform_1(%arg0: i32, %arg1: i32, %arg2: i32) -> (i32, i32) {
    %c0_i32 = arith.constant 0 : i32
    return %arg2, %arg1 : i32, i32
  }
  func.func @transform_2(%arg0: i32, %arg1: i32, %arg2: i32) -> (i32, i32) {
    %c0_i32 = arith.constant 0 : i32
    %c0_i32_0 = arith.constant 0 : i32
    return %c0_i32, %arg1 : i32, i32
  }
  func.func @transform_3(%arg0: i32, %arg1: i32, %arg2: i32) -> (i32, i32) {
    %c0_i32 = arith.constant 0 : i32
    return %arg0, %arg1 : i32, i32
  }
}

</mosaic_0001>

<bundles_post_ra>
// kernel: conv2d_nhwc.1
= control target key start
LH: loop header
LB: loop body
LE: loop exit
PB: predicated region body
PF: predicated region fallthrough
CT: control target
= control target key end

     0   :  { %8 = vsyncpa [#allocation3], 0  ;;  %s2519_s0 = inlined_call_operand.vmem [shape: bf16[1024,256], index: 0, kind: input, shape index: {}]   ;;  %s2520_s1 = inlined_call_operand.vmem [shape: bf16[256,128], index: 1, kind: input, shape index: {}]   ;;  %s2521_s2 = inlined_call_operand.vmem [shape: f32[1,128], index: 2, kind: input, shape index: {}]   ;;  %s2522_s3 = inlined_call_operand.hbm [shape: f32[1024,128], index: 3, kind: output, shape index: {}]  }
   0x1   :  { %10 = vsyncpa [#allocation3 + $0x1], 0  ;;  %s2119_s12 = smov 0   ;;  %s2121_s13 = smov 0  }
   0x2   :  { %s2123_s14 = smov 0   ;;  %s2125_s15 = smov 0  }
   0x3   :  { %s2127_s16 = smov 0   ;;  %s2129_s17 = smov 0  }
   0x4 LB: > { %s1713_s18 = sadd.s32 4294967295, %s2093_s17   ;;  %s1714_s19 = sadd.s32 4294967294, %s2093_s17   ;;  %s2093_s17 = sphi %s2129_s17, %s16_s17   ;;  %s2089_s16 = sphi %s2127_s16, %s2529_s16   ;;  %s2085_s15 = sphi %s2125_s15, %s2528_s15   ;;  %s2081_s14 = sphi %s2123_s14, %s2527_s14   ;;  %s2077_s13 = sphi %s2121_s13, %s2526_s13   ;;  %s2073_s12 = sphi %s2119_s12, %s2525_s12  }
   0x5   : > { %s35_s20 = sadd.s32 1, %s2089_s16  ;;  %s126_s21 = sadd.s32 1, %s2081_s14 }
   0x6   : > { %p37_p0 = scmp.ge.s32.totalorder %s35_s20, 2  ;;  %p136_p1 = scmp.ne.s32.totalorder %s2081_s14, %s2077_s13 }
   0x7   : > { %p137_p2 = scmp.eq.s32.totalorder %s1713_s18, 1  ;;  %p142_p3 = scmp.ne.s32.totalorder %s2077_s13, %s2073_s12 }
   0x8   : > { %s2531_s20 = smov (%p37_p0, %s35_s20), 0  ;;  %p143_p5 = scmp.eq.s32.totalorder %s1714_s19, 1 }
   0x9   : > { %p2159_p4 = por %p137_p2, %p136_p1  ;;  %s121_s23 = ssub.s32 %s2089_s16, %s2531_s20 }
   0xa   : > { %p1719_p6 = scmp.ge.s32.totalorder %s2093_s17, 1  ;;  %p124_p7 = scmp.eq.s32.totalorder %s121_s23, 0 }
   0xb   : > { %p2166_p8 = por %p143_p5, %p142_p3  ;;  %p194_p9 = scmp.lt.s32.totalorder %s2093_s17, 3 }
   0xc   : > { %s2172_s25 = scalar_select %p124_p7, %s2081_s14, %s126_s21  }
   0xd   : > { %p195_p10 = pnand %p1719_p6, %p194_p9 }
   0xe   : > { %v1903_v0 = vld [vmem:[%s2520_s1] sm:$0xff] (!%p195_p10)   ;;  %v2095_v1 = vmov (!%p195_p10), 0   ;;  %s1721_s28 = sshll.u32 (!%p195_p10), %s2085_s15, 6  ;;  %v1904_v2 = vld [vmem:[%s2520_s1 + $0x8] sm:$0xff] (!%p195_p10)   ;;  %v1905_v3 = vld [vmem:[%s2520_s1 + $0x10] sm:$0xff] (!%p195_p10)   ;;  %s231_s30 = sand.u32 (!%p195_p10), 1, %s2077_s13  }
   0xf   : > { %198 = sbr.rel (%p195_p10) target bundleno = 432 (0x1b0), region = 32  ;;  %904 = vmatprep.subr.bf16.mxu0 (!%p195_p10), %v2095_v1  ;;  %1812 = vmatprep.subr.bf16.mxu1 (!%p195_p10), %v2095_v1  ;;  %p236_p11 = scmp.lt.s32.totalorder (!%p195_p10), %s1721_s28, 127  ;;  %v1906_v4 = vld [vmem:[%s2520_s1 + $0x18] sm:$0xff] (!%p195_p10)   ;;  %v1907_v5 = vld [vmem:[%s2520_s1 + $0x20] sm:$0xff] (!%p195_p10)   ;;  %v1908_v7 = vld [vmem:[%s2520_s1 + $0x28] sm:$0xff] (!%p195_p10)  }
  0x10   : > { %905 = vmatpush1.bf16.msra.mxu0 (!%p195_p10), %v1903_v0  ;;  %1828 = vmatpush1.bf16.msra.mxu1 (!%p195_p10), %v1903_v0  ;;  %v1909_v9 = vld [vmem:[%s2520_s1 + $0x30] sm:$0xff] (!%p195_p10)   ;;  %v1910_v10 = vld [vmem:[%s2520_s1 + $0x38] sm:$0xff] (!%p195_p10)   ;;  %v1911_v11 = vld [vmem:[%s2520_s1 + $0x40] sm:$0xff] (!%p195_p10)   ;;  %s1720_s6 = sshll.u32 (!%p195_p10), %s231_s30, 9  ;;  %s1811_s7 = sshll.u32 (!%p195_p10), %s2085_s15, 13 }
  0x11   : > { %906 = vmatprep.subr.bf16.mxu0 (!%p195_p10), %v2095_v1  ;;  %1813 = vmatprep.subr.bf16.mxu1 (!%p195_p10), %v2095_v1  ;;  %v1912_v12 = vld [vmem:[%s2520_s1 + $0x48] sm:$0xff] (!%p195_p10)   ;;  %v1913_v13 = vld [vmem:[%s2520_s1 + $0x50] sm:$0xff] (!%p195_p10)   ;;  %v1914_v14 = vld [vmem:[%s2520_s1 + $0x58] sm:$0xff] (!%p195_p10)   ;;  %s2463_s11 = scalar_lea.hbm (!%p195_p10), %s2522_s3, %s1811_s7  ;;  %s2473_s15 = scalar_lea.sflag (!%p195_p10), [#allocation3], %s231_s30 }
  0x12   : > { %v1915_v15 = vld [vmem:[%s2520_s1 + $0x60] sm:$0xff] (!%p195_p10)   ;;  %v1916_v16 = vld [vmem:[%s2520_s1 + $0x68] sm:$0xff] (!%p195_p10)   ;;  %v1917_v17 = vld [vmem:[%s2520_s1 + $0x70] sm:$0xff] (!%p195_p10)   ;;  %s2096_s21 = smov (!%p195_p10), [#allocation2]  }
  0x13   : > { %v1918_v18 = vld [vmem:[%s2520_s1 + $0x78] sm:$0xff] (!%p195_p10)   ;;  %s2019_s23 = sshll.u32 (!%p195_p10), %s2096_s21, 4  ;;  %s2020_s23 = int_to_ptr.vmem [resolvable:$false] %s2019_s23 }
  0x14   : > { %907 = vmatpush1.bf16.msra.mxu0 (!%p195_p10), %v1904_v2  ;;  %1829 = vmatpush1.bf16.msra.mxu1 (!%p195_p10), %v1904_v2  ;;  %s2021_s26 = scalar_lea.vmem (!%p195_p10), %s2020_s23, 16384 }
  0x15   : > { %908 = vmatprep.subr.bf16.mxu0 (!%p195_p10), %v2095_v1  ;;  %1814 = vmatprep.subr.bf16.mxu1 (!%p195_p10), %v2095_v1 }
  0x16   : > { %s2533_s28 = smov (!%p236_p11, %s1721_s28), 127 }
  0x17   : > { %s1810_s8 = sshll.u32 %s2533_s28, 3 }
  0x18   : > { %909 = vmatpush1.bf16.msra.mxu0 %v1905_v3  ;;  %1830 = vmatpush1.bf16.msra.mxu1 %v1905_v3  ;;  %s2201_s19 = scalar_lea.vmem %s2519_s0, %s1810_s8 }
  0x19   : > { %910 = vmatprep.subr.bf16.mxu0 %v2095_v1  ;;  %1815 = vmatprep.subr.bf16.mxu1 %v2095_v1  ;;  %v1921_v6 = vld [vmem:[%s2201_s19 + $0x4] ss:$8 sps:$4 sm:$0xff]   ;;  %v1919_v19 = vld [vmem:[%s2201_s19] ss:$8 sps:$4 sm:$0xff]   ;;  %v1925_v21 = vld [vmem:[%s2201_s19 + $0x14] ss:$8 sps:$4 sm:$0xff]  }
  0x1a   : > { %v1924_v8 = vld [vmem:[%s2201_s19 + $0x104] ss:$8 sps:$4 sm:$0xff]   ;;  %936 = vmatprep.mubr.bf16.mxu0 %v1921_v6  ;;  %v1922_v20 = vld [vmem:[%s2201_s19 + $0x100] ss:$8 sps:$4 sm:$0xff]   ;;  %v1927_v22 = vld [vmem:[%s2201_s19 + $0x114] ss:$8 sps:$4 sm:$0xff]  }
  0x1b   : > { %1064 = vmatprep.mubr.bf16.mxu1 %v1924_v8  ;;  %v1929_v23 = vld [vmem:[%s2201_s19 + $0x10] ss:$8 sps:$4 sm:$0xff]   ;;  %v1931_v25 = vld [vmem:[%s2201_s19 + $0x24] ss:$8 sps:$4 sm:$0xff]   ;;  %v1935_v27 = vld [vmem:[%s2201_s19 + $0x20] ss:$8 sps:$4 sm:$0xff]  }
  0x1c   : > { %911 = vmatpush1.bf16.msra.mxu0 %v1906_v4  ;;  %1831 = vmatpush1.bf16.msra.mxu1 %v1906_v4  ;;  %v1930_v24 = vld [vmem:[%s2201_s19 + $0x110] ss:$8 sps:$4 sm:$0xff]   ;;  %v1933_v26 = vld [vmem:[%s2201_s19 + $0x124] ss:$8 sps:$4 sm:$0xff]   ;;  %v1936_v28 = vld [vmem:[%s2201_s19 + $0x120] ss:$8 sps:$4 sm:$0xff]  }
  0x1d   : > { %912 = vmatprep.subr.bf16.mxu0 %v2095_v1  ;;  %1816 = vmatprep.subr.bf16.mxu1 %v2095_v1  ;;  %v1937_v29 = vld [vmem:[%s2201_s19 + $0x34] ss:$8 sps:$4 sm:$0xff]   ;;  %v1941_v31 = vld [vmem:[%s2201_s19 + $0x30] ss:$8 sps:$4 sm:$0xff]   ;;  %v1943_v33 = vld [vmem:[%s2201_s19 + $0x44] ss:$8 sps:$4 sm:$0xff]  }
  0x1e   : > { %v1939_v30 = vld [vmem:[%s2201_s19 + $0x134] ss:$8 sps:$4 sm:$0xff]   ;;  %v1942_v32 = vld [vmem:[%s2201_s19 + $0x130] ss:$8 sps:$4 sm:$0xff]   ;;  %v1945_v34 = vld [vmem:[%s2201_s19 + $0x144] ss:$8 sps:$4 sm:$0xff]  }
  0x1f   : > { %v1947_v35 = vld [vmem:[%s2201_s19 + $0x40] ss:$8 sps:$4 sm:$0xff]   ;;  %v1949_v37 = vld [vmem:[%s2201_s19 + $0x54] ss:$8 sps:$4 sm:$0xff]   ;;  %v1953_v39 = vld [vmem:[%s2201_s19 + $0x50] ss:$8 sps:$4 sm:$0xff]  }
  0x20   : > { %913 = vmatpush1.bf16.msra.mxu0 %v1907_v5  ;;  %1832 = vmatpush1.bf16.msra.mxu1 %v1907_v5  ;;  %v1948_v36 = vld [vmem:[%s2201_s19 + $0x140] ss:$8 sps:$4 sm:$0xff]   ;;  %v1951_v38 = vld [vmem:[%s2201_s19 + $0x154] ss:$8 sps:$4 sm:$0xff]   ;;  %v1954_v40 = vld [vmem:[%s2201_s19 + $0x150] ss:$8 sps:$4 sm:$0xff]  }
  0x21   : > { %914 = vmatprep.subr.bf16.mxu0 %v2095_v1  ;;  %1817 = vmatprep.subr.bf16.mxu1 %v2095_v1  ;;  %v1955_v41 = vld [vmem:[%s2201_s19 + $0x64] ss:$8 sps:$4 sm:$0xff]   ;;  %v1959_v43 = vld [vmem:[%s2201_s19 + $0x60] ss:$8 sps:$4 sm:$0xff]   ;;  %v1961_v45 = vld [vmem:[%s2201_s19 + $0x74] ss:$8 sps:$4 sm:$0xff]  }
  0x22   : > { %v1957_v42 = vld [vmem:[%s2201_s19 + $0x164] ss:$8 sps:$4 sm:$0xff]   ;;  %v1960_v44 = vld [vmem:[%s2201_s19 + $0x160] ss:$8 sps:$4 sm:$0xff]   ;;  %v1963_v46 = vld [vmem:[%s2201_s19 + $0x174] ss:$8 sps:$4 sm:$0xff]  }
  0x23   : > { %v1965_v47 = vld [vmem:[%s2201_s19 + $0x70] ss:$8 sps:$4 sm:$0xff]   ;;  %v1967_v49 = vld [vmem:[%s2201_s19 + $0x84] ss:$8 sps:$4 sm:$0xff]   ;;  %v1971_v51 = vld [vmem:[%s2201_s19 + $0x80] ss:$8 sps:$4 sm:$0xff]  }
  0x24   : > { %915 = vmatpush1.bf16.msra.mxu0 %v1908_v7  ;;  %1833 = vmatpush1.bf16.msra.mxu1 %v1908_v7  ;;  %v1966_v48 = vld [vmem:[%s2201_s19 + $0x170] ss:$8 sps:$4 sm:$0xff]   ;;  %v1969_v50 = vld [vmem:[%s2201_s19 + $0x184] ss:$8 sps:$4 sm:$0xff]   ;;  %v1972_v52 = vld [vmem:[%s2201_s19 + $0x180] ss:$8 sps:$4 sm:$0xff]  }
  0x25   : > { %916 = vmatprep.subr.bf16.mxu0 %v2095_v1  ;;  %1818 = vmatprep.subr.bf16.mxu1 %v2095_v1  ;;  %v1973_v53 = vld [vmem:[%s2201_s19 + $0x94] ss:$8 sps:$4 sm:$0xff]   ;;  %v1977_v55 = vld [vmem:[%s2201_s19 + $0x90] ss:$8 sps:$4 sm:$0xff]   ;;  %v1979_v57 = vld [vmem:[%s2201_s19 + $0xa4] ss:$8 sps:$4 sm:$0xff]  }
  0x26   : > { %v1975_v54 = vld [vmem:[%s2201_s19 + $0x194] ss:$8 sps:$4 sm:$0xff]   ;;  %v1978_v56 = vld [vmem:[%s2201_s19 + $0x190] ss:$8 sps:$4 sm:$0xff]   ;;  %v1981_v58 = vld [vmem:[%s2201_s19 + $0x1a4] ss:$8 sps:$4 sm:$0xff]  }
  0x27   : > { %v1983_v59 = vld [vmem:[%s2201_s19 + $0xa0] ss:$8 sps:$4 sm:$0xff]   ;;  %v1985_v61 = vld [vmem:[%s2201_s19 + $0xb4] ss:$8 sps:$4 sm:$0xff]   ;;  %v1989_v63 = vld [vmem:[%s2201_s19 + $0xb0] ss:$8 sps:$4 sm:$0xff]  }
  0x28   : > { %917 = vmatpush1.bf16.msra.mxu0 %v1909_v9  ;;  %1834 = vmatpush1.bf16.msra.mxu1 %v1909_v9  ;;  %v1984_v60 = vld [vmem:[%s2201_s19 + $0x1a0] ss:$8 sps:$4 sm:$0xff]   ;;  %v1987_v62 = vld [vmem:[%s2201_s19 + $0x1b4] ss:$8 sps:$4 sm:$0xff]   ;;  %v1990_v0 = vld [vmem:[%s2201_s19 + $0x1b0] ss:$8 sps:$4 sm:$0xff]  }
  0x29   : > { %918 = vmatprep.subr.bf16.mxu0 %v2095_v1  ;;  %1819 = vmatprep.subr.bf16.mxu1 %v2095_v1  ;;  %v1993_v2 = vld [vmem:[%s2201_s19 + $0x1c4] ss:$8 sps:$4 sm:$0xff]   ;;  %v1995_v3 = vld [vmem:[%s2201_s19 + $0xc0] ss:$8 sps:$4 sm:$0xff]   ;;  %v1997_v5 = vld [vmem:[%s2201_s19 + $0xd4] ss:$8 sps:$4 sm:$0xff]  }
  0x2a   : > { %v1996_v4 = vld [vmem:[%s2201_s19 + $0x1c0] ss:$8 sps:$4 sm:$0xff]   ;;  %v1999_v6 = vld [vmem:[%s2201_s19 + $0x1d4] ss:$8 sps:$4 sm:$0xff]   ;;  %v2001_v7 = vld [vmem:[%s2201_s19 + $0xd0] ss:$8 sps:$4 sm:$0xff]  }
  0x2b   : > { %v2002_v8 = vld [vmem:[%s2201_s19 + $0x1d0] ss:$8 sps:$4 sm:$0xff]   ;;  %v2003_v9 = vld [vmem:[%s2201_s19 + $0xe4] ss:$8 sps:$4 sm:$0xff]  }
  0x2c   : > { %919 = vmatpush1.bf16.msra.mxu0 %v1910_v10  ;;  %1835 = vmatpush1.bf16.msra.mxu1 %v1910_v10  ;;  %v2005_v10 = vld [vmem:[%s2201_s19 + $0x1e4] ss:$8 sps:$4 sm:$0xff]  }
  0x2d   : > { %920 = vmatprep.subr.bf16.mxu0 %v2095_v1  ;;  %1820 = vmatprep.subr.bf16.mxu1 %v2095_v1 }
  0x30   : > { %921 = vmatpush1.bf16.msra.mxu0 %v1911_v11  ;;  %1836 = vmatpush1.bf16.msra.mxu1 %v1911_v11  ;;  %v2007_v11 = vld [vmem:[%s2201_s19 + $0xe0] ss:$8 sps:$4 sm:$0xff]  }
  0x31   : > { %922 = vmatprep.subr.bf16.mxu0 %v2095_v1  ;;  %1821 = vmatprep.subr.bf16.mxu1 %v2095_v1 }
  0x34   : > { %923 = vmatpush1.bf16.msra.mxu0 %v1912_v12  ;;  %1837 = vmatpush1.bf16.msra.mxu1 %v1912_v12  ;;  %v2008_v12 = vld [vmem:[%s2201_s19 + $0x1e0] ss:$8 sps:$4 sm:$0xff]  }
  0x35   : > { %924 = vmatprep.subr.bf16.mxu0 %v2095_v1  ;;  %1822 = vmatprep.subr.bf16.mxu1 %v2095_v1 }
  0x38   : > { %925 = vmatpush1.bf16.msra.mxu0 %v1913_v13  ;;  %1838 = vmatpush1.bf16.msra.mxu1 %v1913_v13  ;;  %v2009_v13 = vld [vmem:[%s2201_s19 + $0xf4] ss:$8 sps:$4 sm:$0xff]  }
  0x39   : > { %926 = vmatprep.subr.bf16.mxu0 %v2095_v1  ;;  %1823 = vmatprep.subr.bf16.mxu1 %v2095_v1 }
  0x3c   : > { %927 = vmatpush1.bf16.msra.mxu0 %v1914_v14  ;;  %1839 = vmatpush1.bf16.msra.mxu1 %v1914_v14  ;;  %v2011_v14 = vld [vmem:[%s2201_s19 + $0x1f4] ss:$8 sps:$4 sm:$0xff]  }
  0x3d   : > { %928 = vmatprep.subr.bf16.mxu0 %v2095_v1  ;;  %1824 = vmatprep.subr.bf16.mxu1 %v2095_v1 }
  0x40   : > { %929 = vmatpush1.bf16.msra.mxu0 %v1915_v15  ;;  %1840 = vmatpush1.bf16.msra.mxu1 %v1915_v15  ;;  %v2013_v15 = vld [vmem:[%s2201_s19 + $0xf0] ss:$8 sps:$4 sm:$0xff]  }
  0x41   : > { %930 = vmatprep.subr.bf16.mxu0 %v2095_v1  ;;  %1825 = vmatprep.subr.bf16.mxu1 %v2095_v1 }
  0x44   : > { %931 = vmatpush1.bf16.msra.mxu0 %v1916_v16  ;;  %1841 = vmatpush1.bf16.msra.mxu1 %v1916_v16  ;;  %v2014_v16 = vld [vmem:[%s2201_s19 + $0x1f0] ss:$8 sps:$4 sm:$0xff]  }
  0x45   : > { %932 = vmatprep.subr.bf16.mxu0 %v2095_v1  ;;  %1826 = vmatprep.subr.bf16.mxu1 %v2095_v1 }
  0x48   : > { %933 = vmatpush1.bf16.msra.mxu0 %v1917_v17  ;;  %1842 = vmatpush1.bf16.msra.mxu1 %v1917_v17 }
  0x49   : > { %934 = vmatprep.subr.bf16.mxu0 %v2095_v1  ;;  %1827 = vmatprep.subr.bf16.mxu1 %v2095_v1  ;;  %v1991_v1 = vld [vmem:[%s2201_s19 + $0xc4] ss:$8 sps:$4 sm:$0xff]   ;;  %s2336_s19 = scalar_lea.vmem [#allocation2], %s1720_s6 }
  0x4a   : > { %s1602_s8 = sshll.u32 %s2336_s19, 4  ;;  %s2465_s8 = int_to_ptr.vmem [resolvable:$true] %s1602_s8 }
  0x4b   : > { %s2015_s18 = scalar_lea.vmem %s2465_s8, 8192  ;;  %p2022_p1 = scmp.lt.s32.totalorder %s2465_s8, %s2020_s23 }
  0x4c   : > { %935 = vmatpush1.bf16.msra.mxu0 %v1918_v18  ;;  %1843 = vmatpush1.bf16.msra.mxu1 %v1918_v18  ;;  %v2328_v18 = vld [vmem:[%s2521_s2] ss:$0 sm:$0xff]  ;;  %p2016_p12 = scmp.ne.s32.totalorder %s2465_s8, %s2015_s18  ;;  %p2023_p2 = scmp.lt.s32.totalorder %s2021_s26, %s2015_s18 }
  0x4e   : > { %p2017_p13 = pnand %p2016_p12, %p2159_p4  ;;  %p2024_p3 = por %p2023_p2, %p2022_p1 }
  0x4f   : > { %937 = vmatmul.mubr.bf16.vlgmr.msra.gmra.mrb[0].mxu0 %v1919_v19  ;;  %1065 = vmatmul.mubr.bf16.vlgmr.msra.gmra.mrb[0].mxu1 %v1922_v20 }
  0x50   : > { %944 = vmatprep.mubr.bf16.mxu0 %v1925_v21  ;;  %1072 = vmatprep.mubr.bf16.mxu1 %v1927_v22  ;;  %p2018_p0 = pneg %p2017_p13 }
  0x52   : > { %p2025_p5 = pnand %p2024_p3, %p2018_p0 }
  0x57   : > { %945 = vmatmul.mubr.bf16.gmra.mrb[4].mxu0 %v1929_v23  ;;  %1073 = vmatmul.mubr.bf16.gmra.mrb[4].mxu1 %v1930_v24 }
  0x58   : > { %952 = vmatprep.mubr.bf16.mxu0 %v1931_v25  ;;  %1080 = vmatprep.mubr.bf16.mxu1 %v1933_v26 }
  0x5f   : > { %953 = vmatmul.mubr.bf16.gmra.mrb[8].mxu0 %v1935_v27  ;;  %1081 = vmatmul.mubr.bf16.gmra.mrb[8].mxu1 %v1936_v28 }
  0x60   : > { %960 = vmatprep.mubr.bf16.mxu0 %v1937_v29  ;;  %1088 = vmatprep.mubr.bf16.mxu1 %v1939_v30 }
  0x67   : > { %961 = vmatmul.mubr.bf16.gmra.mrb[12].mxu0 %v1941_v31  ;;  %1089 = vmatmul.mubr.bf16.gmra.mrb[12].mxu1 %v1942_v32 }
  0x68   : > { %968 = vmatprep.mubr.bf16.mxu0 %v1943_v33  ;;  %1096 = vmatprep.mubr.bf16.mxu1 %v1945_v34 }
  0x6f   : > { %969 = vmatmul.mubr.bf16.gmra.mrb[16].mxu0 %v1947_v35  ;;  %1097 = vmatmul.mubr.bf16.gmra.mrb[16].mxu1 %v1948_v36 }
  0x70   : > { %976 = vmatprep.mubr.bf16.mxu0 %v1949_v37  ;;  %1104 = vmatprep.mubr.bf16.mxu1 %v1951_v38 }
  0x77   : > { %977 = vmatmul.mubr.bf16.gmra.mrb[20].mxu0 %v1953_v39  ;;  %1105 = vmatmul.mubr.bf16.gmra.mrb[20].mxu1 %v1954_v40 }
  0x78   : > { %984 = vmatprep.mubr.bf16.mxu0 %v1955_v41  ;;  %1112 = vmatprep.mubr.bf16.mxu1 %v1957_v42 }
  0x7f   : > { %985 = vmatmul.mubr.bf16.gmra.mrb[24].mxu0 %v1959_v43  ;;  %1113 = vmatmul.mubr.bf16.gmra.mrb[24].mxu1 %v1960_v44 }
  0x80   : > { %992 = vmatprep.mubr.bf16.mxu0 %v1961_v45  ;;  %1120 = vmatprep.mubr.bf16.mxu1 %v1963_v46 }
  0x87   : > { %993 = vmatmul.mubr.bf16.gmra.mrb[28].mxu0 %v1965_v47  ;;  %1121 = vmatmul.mubr.bf16.gmra.mrb[28].mxu1 %v1966_v48 }
  0x88   : > { %1000 = vmatprep.mubr.bf16.mxu0 %v1967_v49  ;;  %1128 = vmatprep.mubr.bf16.mxu1 %v1969_v50 }
  0x8f   : > { %1001 = vmatmul.mubr.bf16.gmra.mrb[32].mxu0 %v1971_v51  ;;  %1129 = vmatmul.mubr.bf16.gmra.mrb[32].mxu1 %v1972_v52 }
  0x90   : > { %1008 = vmatprep.mubr.bf16.mxu0 %v1973_v53  ;;  %1136 = vmatprep.mubr.bf16.mxu1 %v1975_v54 }
  0x97   : > { %1009 = vmatmul.mubr.bf16.gmra.mrb[36].mxu0 %v1977_v55  ;;  %1137 = vmatmul.mubr.bf16.gmra.mrb[36].mxu1 %v1978_v56 }
  0x98   : > { %1016 = vmatprep.mubr.bf16.mxu0 %v1979_v57  ;;  %1144 = vmatprep.mubr.bf16.mxu1 %v1981_v58 }
  0x9f   : > { %1017 = vmatmul.mubr.bf16.gmra.mrb[40].mxu0 %v1983_v59  ;;  %1145 = vmatmul.mubr.bf16.gmra.mrb[40].mxu1 %v1984_v60 }
  0xa0   : > { %1024 = vmatprep.mubr.bf16.mxu0 %v1985_v61  ;;  %1152 = vmatprep.mubr.bf16.mxu1 %v1987_v62 }
  0xa7   : > { %1025 = vmatmul.mubr.bf16.gmra.mrb[44].mxu0 %v1989_v63  ;;  %1153 = vmatmul.mubr.bf16.gmra.mrb[44].mxu1 %v1990_v0 }
  0xa8   : > { %1032 = vmatprep.mubr.bf16.mxu0 %v1991_v1  ;;  %1160 = vmatprep.mubr.bf16.mxu1 %v1993_v2 }
  0xaf   : > { %1033 = vmatmul.mubr.bf16.gmra.mrb[48].mxu0 %v1995_v3  ;;  %1161 = vmatmul.mubr.bf16.gmra.mrb[48].mxu1 %v1996_v4 }
  0xb0   : > { %1040 = vmatprep.mubr.bf16.mxu0 %v1997_v5  ;;  %1168 = vmatprep.mubr.bf16.mxu1 %v1999_v6 }
  0xb7   : > { %1041 = vmatmul.mubr.bf16.gmra.mrb[52].mxu0 %v2001_v7  ;;  %1169 = vmatmul.mubr.bf16.gmra.mrb[52].mxu1 %v2002_v8 }
  0xb8   : > { %1048 = vmatprep.mubr.bf16.mxu0 %v2003_v9  ;;  %1176 = vmatprep.mubr.bf16.mxu1 %v2005_v10 }
  0xbf   : > { %1049 = vmatmul.mubr.bf16.gmra.mrb[56].mxu0 %v2007_v11  ;;  %1177 = vmatmul.mubr.bf16.gmra.mrb[56].mxu1 %v2008_v12 }
  0xc0   : > { %1056 = vmatprep.mubr.bf16.mxu0 %v2009_v13  ;;  %1184 = vmatprep.mubr.bf16.mxu1 %v2011_v14 }
  0xc7   : > { %1057 = vmatmul.mubr.bf16.gmra.mrb[60].mxu0 %v2013_v15  ;;  %1185 = vmatmul.mubr.bf16.gmra.mrb[60].mxu1 %v2014_v16 }
 0x122   : > { %v938_v17 = vpop.f32.mrb[0].mxu0  ;;  %v1066_v19 = vpop.f32.mrb[0].mxu1 }
 0x123   : > { %v940_v20 = vpop.f32.mrb[1].mxu0  ;;  %v1068_v21 = vpop.f32.mrb[1].mxu1  ;;  %v1395_v24 = vadd.f32 %v2328_v18, %v938_v17  ;;  %v1427_v25 = vadd.f32 %v2328_v18, %v1066_v19 }
 0x124   : > { %v941_v22 = vpop.f32.mrb[2].mxu0  ;;  %v1069_v23 = vpop.f32.mrb[2].mxu1 }
 0x125   : > { %v943_v26 = vpop.f32.mrb[3].mxu0  ;;  %v1071_v27 = vpop.f32.mrb[3].mxu1  ;;  %v1459_v28 = vmax.f32 %v1395_v24, 0.0  ;;  %v1491_v29 = vmax.f32 %v1427_v25, 0.0  ;;  %v1396_v30 = vadd.f32 %v2328_v18, %v941_v22  ;;  %v1428_v31 = vadd.f32 %v2328_v18, %v1069_v23 }
 0x127   : > { %1523 = vst [vmem:[%s2336_s19] sm:$0xff] %v1459_v28  ;;  %1555 = vst [vmem:[%s2336_s19 + $0x100] sm:$0xff] %v1491_v29  ;;  %v1460_v32 = vmax.f32 %v1396_v30, 0.0  ;;  %v1492_v33 = vmax.f32 %v1428_v31, 0.0 }
 0x129   : > { %1524 = vst [vmem:[%s2336_s19 + $0x8] sm:$0xff] %v1460_v32  ;;  %1556 = vst [vmem:[%s2336_s19 + $0x108] sm:$0xff] %v1492_v33 }
 0x12a   : > { %v946_v34 = vpop.f32.mrb[4].mxu0  ;;  %v1074_v35 = vpop.f32.mrb[4].mxu1 }
 0x12b   : > { %v948_v36 = vpop.f32.mrb[5].mxu0  ;;  %v1076_v37 = vpop.f32.mrb[5].mxu1  ;;  %v1397_v40 = vadd.f32 %v2328_v18, %v946_v34  ;;  %v1429_v41 = vadd.f32 %v2328_v18, %v1074_v35 }
 0x12c   : > { %v949_v38 = vpop.f32.mrb[6].mxu0  ;;  %v1077_v39 = vpop.f32.mrb[6].mxu1 }
 0x12d   : > { %v951_v42 = vpop.f32.mrb[7].mxu0  ;;  %v1079_v43 = vpop.f32.mrb[7].mxu1  ;;  %v1461_v44 = vmax.f32 %v1397_v40, 0.0  ;;  %v1493_v45 = vmax.f32 %v1429_v41, 0.0  ;;  %v1398_v46 = vadd.f32 %v2328_v18, %v949_v38  ;;  %v1430_v47 = vadd.f32 %v2328_v18, %v1077_v39 }
 0x12f   : > { %1525 = vst [vmem:[%s2336_s19 + $0x10] sm:$0xff] %v1461_v44  ;;  %1557 = vst [vmem:[%s2336_s19 + $0x110] sm:$0xff] %v1493_v45  ;;  %v1462_v48 = vmax.f32 %v1398_v46, 0.0  ;;  %v1494_v49 = vmax.f32 %v1430_v47, 0.0 }
 0x131   : > { %1526 = vst [vmem:[%s2336_s19 + $0x18] sm:$0xff] %v1462_v48  ;;  %1558 = vst [vmem:[%s2336_s19 + $0x118] sm:$0xff] %v1494_v49 }
 0x132   : > { %v954_v50 = vpop.f32.mrb[8].mxu0  ;;  %v1082_v51 = vpop.f32.mrb[8].mxu1 }
 0x133   : > { %v956_v52 = vpop.f32.mrb[9].mxu0  ;;  %v1084_v53 = vpop.f32.mrb[9].mxu1  ;;  %v1399_v56 = vadd.f32 %v2328_v18, %v954_v50  ;;  %v1431_v57 = vadd.f32 %v2328_v18, %v1082_v51 }
 0x134   : > { %v957_v54 = vpop.f32.mrb[10].mxu0  ;;  %v1085_v55 = vpop.f32.mrb[10].mxu1 }
 0x135   : > { %v959_v58 = vpop.f32.mrb[11].mxu0  ;;  %v1087_v59 = vpop.f32.mrb[11].mxu1  ;;  %v1463_v60 = vmax.f32 %v1399_v56, 0.0  ;;  %v1495_v61 = vmax.f32 %v1431_v57, 0.0  ;;  %v1400_v62 = vadd.f32 %v2328_v18, %v957_v54  ;;  %v1432_v63 = vadd.f32 %v2328_v18, %v1085_v55 }
 0x137   : > { %1527 = vst [vmem:[%s2336_s19 + $0x20] sm:$0xff] %v1463_v60  ;;  %1559 = vst [vmem:[%s2336_s19 + $0x120] sm:$0xff] %v1495_v61  ;;  %v1464_v0 = vmax.f32 %v1400_v62, 0.0  ;;  %v1496_v1 = vmax.f32 %v1432_v63, 0.0 }
 0x139   : > { %1528 = vst [vmem:[%s2336_s19 + $0x28] sm:$0xff] %v1464_v0  ;;  %1560 = vst [vmem:[%s2336_s19 + $0x128] sm:$0xff] %v1496_v1 }
 0x13a   : > { %v962_v2 = vpop.f32.mrb[12].mxu0  ;;  %v1090_v3 = vpop.f32.mrb[12].mxu1 }
 0x13b   : > { %v964_v4 = vpop.f32.mrb[13].mxu0  ;;  %v1092_v5 = vpop.f32.mrb[13].mxu1  ;;  %v1401_v8 = vadd.f32 %v2328_v18, %v962_v2  ;;  %v1433_v9 = vadd.f32 %v2328_v18, %v1090_v3 }
 0x13c   : > { %v965_v6 = vpop.f32.mrb[14].mxu0  ;;  %v1093_v7 = vpop.f32.mrb[14].mxu1 }
 0x13d   : > { %v967_v10 = vpop.f32.mrb[15].mxu0  ;;  %v1095_v11 = vpop.f32.mrb[15].mxu1  ;;  %v1465_v12 = vmax.f32 %v1401_v8, 0.0  ;;  %v1497_v13 = vmax.f32 %v1433_v9, 0.0  ;;  %v1402_v14 = vadd.f32 %v2328_v18, %v965_v6  ;;  %v1434_v15 = vadd.f32 %v2328_v18, %v1093_v7 }
 0x13f   : > { %1529 = vst [vmem:[%s2336_s19 + $0x30] sm:$0xff] %v1465_v12  ;;  %1561 = vst [vmem:[%s2336_s19 + $0x130] sm:$0xff] %v1497_v13  ;;  %v1466_v16 = vmax.f32 %v1402_v14, 0.0  ;;  %v1498_v17 = vmax.f32 %v1434_v15, 0.0 }
 0x141   : > { %1530 = vst [vmem:[%s2336_s19 + $0x38] sm:$0xff] %v1466_v16  ;;  %1562 = vst [vmem:[%s2336_s19 + $0x138] sm:$0xff] %v1498_v17 }
 0x142   : > { %v970_v19 = vpop.f32.mrb[16].mxu0  ;;  %v1098_v20 = vpop.f32.mrb[16].mxu1 }
 0x143   : > { %v972_v21 = vpop.f32.mrb[17].mxu0  ;;  %v1100_v22 = vpop.f32.mrb[17].mxu1  ;;  %v1403_v25 = vadd.f32 %v2328_v18, %v970_v19  ;;  %v1435_v26 = vadd.f32 %v2328_v18, %v1098_v20 }
 0x144   : > { %v973_v23 = vpop.f32.mrb[18].mxu0  ;;  %v1101_v24 = vpop.f32.mrb[18].mxu1 }
 0x145   : > { %v975_v27 = vpop.f32.mrb[19].mxu0  ;;  %v1103_v28 = vpop.f32.mrb[19].mxu1  ;;  %v1467_v29 = vmax.f32 %v1403_v25, 0.0  ;;  %v1499_v30 = vmax.f32 %v1435_v26, 0.0  ;;  %v1404_v31 = vadd.f32 %v2328_v18, %v973_v23  ;;  %v1436_v32 = vadd.f32 %v2328_v18, %v1101_v24 }
 0x147   : > { %1531 = vst [vmem:[%s2336_s19 + $0x40] sm:$0xff] %v1467_v29  ;;  %1563 = vst [vmem:[%s2336_s19 + $0x140] sm:$0xff] %v1499_v30  ;;  %v1468_v33 = vmax.f32 %v1404_v31, 0.0  ;;  %v1500_v34 = vmax.f32 %v1436_v32, 0.0 }
 0x149   : > { %1532 = vst [vmem:[%s2336_s19 + $0x48] sm:$0xff] %v1468_v33  ;;  %1564 = vst [vmem:[%s2336_s19 + $0x148] sm:$0xff] %v1500_v34 }
 0x14a   : > { %v978_v35 = vpop.f32.mrb[20].mxu0  ;;  %v1106_v36 = vpop.f32.mrb[20].mxu1 }
 0x14b   : > { %v980_v37 = vpop.f32.mrb[21].mxu0  ;;  %v1108_v38 = vpop.f32.mrb[21].mxu1  ;;  %v1405_v41 = vadd.f32 %v2328_v18, %v978_v35  ;;  %v1437_v42 = vadd.f32 %v2328_v18, %v1106_v36 }
 0x14c   : > { %v981_v39 = vpop.f32.mrb[22].mxu0  ;;  %v1109_v40 = vpop.f32.mrb[22].mxu1 }
 0x14d   : > { %v983_v43 = vpop.f32.mrb[23].mxu0  ;;  %v1111_v44 = vpop.f32.mrb[23].mxu1  ;;  %v1469_v45 = vmax.f32 %v1405_v41, 0.0  ;;  %v1501_v46 = vmax.f32 %v1437_v42, 0.0  ;;  %v1406_v47 = vadd.f32 %v2328_v18, %v981_v39  ;;  %v1438_v48 = vadd.f32 %v2328_v18, %v1109_v40 }
 0x14f   : > { %1533 = vst [vmem:[%s2336_s19 + $0x50] sm:$0xff] %v1469_v45  ;;  %1565 = vst [vmem:[%s2336_s19 + $0x150] sm:$0xff] %v1501_v46  ;;  %v1470_v49 = vmax.f32 %v1406_v47, 0.0  ;;  %v1502_v50 = vmax.f32 %v1438_v48, 0.0 }
 0x151   : > { %1534 = vst [vmem:[%s2336_s19 + $0x58] sm:$0xff] %v1470_v49  ;;  %1566 = vst [vmem:[%s2336_s19 + $0x158] sm:$0xff] %v1502_v50 }
 0x152   : > { %v986_v51 = vpop.f32.mrb[24].mxu0  ;;  %v1114_v52 = vpop.f32.mrb[24].mxu1 }
 0x153   : > { %v988_v53 = vpop.f32.mrb[25].mxu0  ;;  %v1116_v54 = vpop.f32.mrb[25].mxu1  ;;  %v1407_v57 = vadd.f32 %v2328_v18, %v986_v51  ;;  %v1439_v58 = vadd.f32 %v2328_v18, %v1114_v52 }
 0x154   : > { %v989_v55 = vpop.f32.mrb[26].mxu0  ;;  %v1117_v56 = vpop.f32.mrb[26].mxu1 }
 0x155   : > { %v991_v59 = vpop.f32.mrb[27].mxu0  ;;  %v1119_v60 = vpop.f32.mrb[27].mxu1  ;;  %v1471_v61 = vmax.f32 %v1407_v57, 0.0  ;;  %v1503_v62 = vmax.f32 %v1439_v58, 0.0  ;;  %v1408_v63 = vadd.f32 %v2328_v18, %v989_v55  ;;  %v1440_v0 = vadd.f32 %v2328_v18, %v1117_v56 }
 0x157   : > { %1535 = vst [vmem:[%s2336_s19 + $0x60] sm:$0xff] %v1471_v61  ;;  %1567 = vst [vmem:[%s2336_s19 + $0x160] sm:$0xff] %v1503_v62  ;;  %v1472_v1 = vmax.f32 %v1408_v63, 0.0  ;;  %v1504_v2 = vmax.f32 %v1440_v0, 0.0 }
 0x159   : > { %1536 = vst [vmem:[%s2336_s19 + $0x68] sm:$0xff] %v1472_v1  ;;  %1568 = vst [vmem:[%s2336_s19 + $0x168] sm:$0xff] %v1504_v2 }
 0x15a   : > { %v994_v3 = vpop.f32.mrb[28].mxu0  ;;  %v1122_v4 = vpop.f32.mrb[28].mxu1 }
 0x15b   : > { %v996_v5 = vpop.f32.mrb[29].mxu0  ;;  %v1124_v6 = vpop.f32.mrb[29].mxu1  ;;  %v1409_v9 = vadd.f32 %v2328_v18, %v994_v3  ;;  %v1441_v10 = vadd.f32 %v2328_v18, %v1122_v4 }
 0x15c   : > { %v997_v7 = vpop.f32.mrb[30].mxu0  ;;  %v1125_v8 = vpop.f32.mrb[30].mxu1 }
 0x15d   : > { %v999_v11 = vpop.f32.mrb[31].mxu0  ;;  %v1127_v12 = vpop.f32.mrb[31].mxu1  ;;  %v1473_v13 = vmax.f32 %v1409_v9, 0.0  ;;  %v1505_v14 = vmax.f32 %v1441_v10, 0.0  ;;  %v1410_v15 = vadd.f32 %v2328_v18, %v997_v7  ;;  %v1442_v16 = vadd.f32 %v2328_v18, %v1125_v8 }
 0x15f   : > { %1537 = vst [vmem:[%s2336_s19 + $0x70] sm:$0xff] %v1473_v13  ;;  %1569 = vst [vmem:[%s2336_s19 + $0x170] sm:$0xff] %v1505_v14  ;;  %v1474_v17 = vmax.f32 %v1410_v15, 0.0  ;;  %v1506_v19 = vmax.f32 %v1442_v16, 0.0 }
 0x161   : > { %1538 = vst [vmem:[%s2336_s19 + $0x78] sm:$0xff] %v1474_v17  ;;  %1570 = vst [vmem:[%s2336_s19 + $0x178] sm:$0xff] %v1506_v19 }
 0x162   : > { %v1002_v20 = vpop.f32.mrb[32].mxu0  ;;  %v1130_v21 = vpop.f32.mrb[32].mxu1 }
 0x163   : > { %v1004_v22 = vpop.f32.mrb[33].mxu0  ;;  %v1132_v23 = vpop.f32.mrb[33].mxu1  ;;  %v1411_v26 = vadd.f32 %v2328_v18, %v1002_v20  ;;  %v1443_v27 = vadd.f32 %v2328_v18, %v1130_v21 }
 0x164   : > { %v1005_v24 = vpop.f32.mrb[34].mxu0  ;;  %v1133_v25 = vpop.f32.mrb[34].mxu1 }
 0x165   : > { %v1007_v28 = vpop.f32.mrb[35].mxu0  ;;  %v1135_v29 = vpop.f32.mrb[35].mxu1  ;;  %v1475_v30 = vmax.f32 %v1411_v26, 0.0  ;;  %v1507_v31 = vmax.f32 %v1443_v27, 0.0  ;;  %v1412_v32 = vadd.f32 %v2328_v18, %v1005_v24  ;;  %v1444_v33 = vadd.f32 %v2328_v18, %v1133_v25 }
 0x167   : > { %1539 = vst [vmem:[%s2336_s19 + $0x80] sm:$0xff] %v1475_v30  ;;  %1571 = vst [vmem:[%s2336_s19 + $0x180] sm:$0xff] %v1507_v31  ;;  %v1476_v34 = vmax.f32 %v1412_v32, 0.0  ;;  %v1508_v35 = vmax.f32 %v1444_v33, 0.0 }
 0x169   : > { %1540 = vst [vmem:[%s2336_s19 + $0x88] sm:$0xff] %v1476_v34  ;;  %1572 = vst [vmem:[%s2336_s19 + $0x188] sm:$0xff] %v1508_v35 }
 0x16a   : > { %v1010_v36 = vpop.f32.mrb[36].mxu0  ;;  %v1138_v37 = vpop.f32.mrb[36].mxu1 }
 0x16b   : > { %v1012_v38 = vpop.f32.mrb[37].mxu0  ;;  %v1140_v39 = vpop.f32.mrb[37].mxu1  ;;  %v1413_v42 = vadd.f32 %v2328_v18, %v1010_v36  ;;  %v1445_v43 = vadd.f32 %v2328_v18, %v1138_v37 }
 0x16c   : > { %v1013_v40 = vpop.f32.mrb[38].mxu0  ;;  %v1141_v41 = vpop.f32.mrb[38].mxu1 }
 0x16d   : > { %v1015_v44 = vpop.f32.mrb[39].mxu0  ;;  %v1143_v45 = vpop.f32.mrb[39].mxu1  ;;  %v1477_v46 = vmax.f32 %v1413_v42, 0.0  ;;  %v1509_v47 = vmax.f32 %v1445_v43, 0.0  ;;  %v1414_v48 = vadd.f32 %v2328_v18, %v1013_v40  ;;  %v1446_v49 = vadd.f32 %v2328_v18, %v1141_v41 }
 0x16f   : > { %1541 = vst [vmem:[%s2336_s19 + $0x90] sm:$0xff] %v1477_v46  ;;  %1573 = vst [vmem:[%s2336_s19 + $0x190] sm:$0xff] %v1509_v47  ;;  %v1478_v50 = vmax.f32 %v1414_v48, 0.0  ;;  %v1510_v51 = vmax.f32 %v1446_v49, 0.0 }
 0x171   : > { %1542 = vst [vmem:[%s2336_s19 + $0x98] sm:$0xff] %v1478_v50  ;;  %1574 = vst [vmem:[%s2336_s19 + $0x198] sm:$0xff] %v1510_v51 }
 0x172   : > { %v1018_v52 = vpop.f32.mrb[40].mxu0  ;;  %v1146_v53 = vpop.f32.mrb[40].mxu1 }
 0x173   : > { %v1020_v54 = vpop.f32.mrb[41].mxu0  ;;  %v1148_v55 = vpop.f32.mrb[41].mxu1  ;;  %v1415_v58 = vadd.f32 %v2328_v18, %v1018_v52  ;;  %v1447_v59 = vadd.f32 %v2328_v18, %v1146_v53 }
 0x174   : > { %v1021_v56 = vpop.f32.mrb[42].mxu0  ;;  %v1149_v57 = vpop.f32.mrb[42].mxu1 }
 0x175   : > { %v1023_v60 = vpop.f32.mrb[43].mxu0  ;;  %v1151_v61 = vpop.f32.mrb[43].mxu1  ;;  %v1479_v62 = vmax.f32 %v1415_v58, 0.0  ;;  %v1511_v63 = vmax.f32 %v1447_v59, 0.0  ;;  %v1416_v0 = vadd.f32 %v2328_v18, %v1021_v56  ;;  %v1448_v1 = vadd.f32 %v2328_v18, %v1149_v57 }
 0x177   : > { %1543 = vst [vmem:[%s2336_s19 + $0xa0] sm:$0xff] %v1479_v62  ;;  %1575 = vst [vmem:[%s2336_s19 + $0x1a0] sm:$0xff] %v1511_v63  ;;  %v1480_v2 = vmax.f32 %v1416_v0, 0.0  ;;  %v1512_v3 = vmax.f32 %v1448_v1, 0.0 }
 0x179   : > { %1544 = vst [vmem:[%s2336_s19 + $0xa8] sm:$0xff] %v1480_v2  ;;  %1576 = vst [vmem:[%s2336_s19 + $0x1a8] sm:$0xff] %v1512_v3 }
 0x17a   : > { %v1026_v4 = vpop.f32.mrb[44].mxu0  ;;  %v1154_v5 = vpop.f32.mrb[44].mxu1 }
 0x17b   : > { %v1028_v6 = vpop.f32.mrb[45].mxu0  ;;  %v1156_v7 = vpop.f32.mrb[45].mxu1  ;;  %v1417_v10 = vadd.f32 %v2328_v18, %v1026_v4  ;;  %v1449_v11 = vadd.f32 %v2328_v18, %v1154_v5 }
 0x17c   : > { %v1029_v8 = vpop.f32.mrb[46].mxu0  ;;  %v1157_v9 = vpop.f32.mrb[46].mxu1 }
 0x17d   : > { %v1031_v12 = vpop.f32.mrb[47].mxu0  ;;  %v1159_v13 = vpop.f32.mrb[47].mxu1  ;;  %v1481_v14 = vmax.f32 %v1417_v10, 0.0  ;;  %v1513_v15 = vmax.f32 %v1449_v11, 0.0  ;;  %v1418_v16 = vadd.f32 %v2328_v18, %v1029_v8  ;;  %v1450_v17 = vadd.f32 %v2328_v18, %v1157_v9 }
 0x17f   : > { %1545 = vst [vmem:[%s2336_s19 + $0xb0] sm:$0xff] %v1481_v14  ;;  %1577 = vst [vmem:[%s2336_s19 + $0x1b0] sm:$0xff] %v1513_v15  ;;  %v1482_v19 = vmax.f32 %v1418_v16, 0.0  ;;  %v1514_v20 = vmax.f32 %v1450_v17, 0.0 }
 0x181   : > { %1546 = vst [vmem:[%s2336_s19 + $0xb8] sm:$0xff] %v1482_v19  ;;  %1578 = vst [vmem:[%s2336_s19 + $0x1b8] sm:$0xff] %v1514_v20 }
 0x182   : > { %v1034_v21 = vpop.f32.mrb[48].mxu0  ;;  %v1162_v22 = vpop.f32.mrb[48].mxu1 }
 0x183   : > { %v1036_v23 = vpop.f32.mrb[49].mxu0  ;;  %v1164_v24 = vpop.f32.mrb[49].mxu1  ;;  %v1419_v27 = vadd.f32 %v2328_v18, %v1034_v21  ;;  %v1451_v28 = vadd.f32 %v2328_v18, %v1162_v22 }
 0x184   : > { %v1037_v25 = vpop.f32.mrb[50].mxu0  ;;  %v1165_v26 = vpop.f32.mrb[50].mxu1 }
 0x185   : > { %v1039_v29 = vpop.f32.mrb[51].mxu0  ;;  %v1167_v30 = vpop.f32.mrb[51].mxu1  ;;  %v1483_v31 = vmax.f32 %v1419_v27, 0.0  ;;  %v1515_v32 = vmax.f32 %v1451_v28, 0.0  ;;  %v1420_v33 = vadd.f32 %v2328_v18, %v1037_v25  ;;  %v1452_v34 = vadd.f32 %v2328_v18, %v1165_v26 }
 0x187   : > { %1547 = vst [vmem:[%s2336_s19 + $0xc0] sm:$0xff] %v1483_v31  ;;  %1579 = vst [vmem:[%s2336_s19 + $0x1c0] sm:$0xff] %v1515_v32  ;;  %v1484_v35 = vmax.f32 %v1420_v33, 0.0  ;;  %v1516_v36 = vmax.f32 %v1452_v34, 0.0 }
 0x189   : > { %1548 = vst [vmem:[%s2336_s19 + $0xc8] sm:$0xff] %v1484_v35  ;;  %1580 = vst [vmem:[%s2336_s19 + $0x1c8] sm:$0xff] %v1516_v36 }
 0x18a   : > { %v1042_v37 = vpop.f32.mrb[52].mxu0  ;;  %v1170_v38 = vpop.f32.mrb[52].mxu1 }
 0x18b   : > { %v1044_v39 = vpop.f32.mrb[53].mxu0  ;;  %v1172_v40 = vpop.f32.mrb[53].mxu1  ;;  %v1421_v43 = vadd.f32 %v2328_v18, %v1042_v37  ;;  %v1453_v44 = vadd.f32 %v2328_v18, %v1170_v38 }
 0x18c   : > { %v1045_v41 = vpop.f32.mrb[54].mxu0  ;;  %v1173_v42 = vpop.f32.mrb[54].mxu1 }
 0x18d   : > { %v1047_v45 = vpop.f32.mrb[55].mxu0  ;;  %v1175_v46 = vpop.f32.mrb[55].mxu1  ;;  %v1485_v47 = vmax.f32 %v1421_v43, 0.0  ;;  %v1517_v48 = vmax.f32 %v1453_v44, 0.0  ;;  %v1422_v49 = vadd.f32 %v2328_v18, %v1045_v41  ;;  %v1454_v50 = vadd.f32 %v2328_v18, %v1173_v42 }
 0x18f   : > { %1549 = vst [vmem:[%s2336_s19 + $0xd0] sm:$0xff] %v1485_v47  ;;  %1581 = vst [vmem:[%s2336_s19 + $0x1d0] sm:$0xff] %v1517_v48  ;;  %v1486_v51 = vmax.f32 %v1422_v49, 0.0  ;;  %v1518_v52 = vmax.f32 %v1454_v50, 0.0 }
 0x191   : > { %1550 = vst [vmem:[%s2336_s19 + $0xd8] sm:$0xff] %v1486_v51  ;;  %1582 = vst [vmem:[%s2336_s19 + $0x1d8] sm:$0xff] %v1518_v52 }
 0x192   : > { %v1050_v53 = vpop.f32.mrb[56].mxu0  ;;  %v1178_v54 = vpop.f32.mrb[56].mxu1 }
 0x193   : > { %v1052_v55 = vpop.f32.mrb[57].mxu0  ;;  %v1180_v56 = vpop.f32.mrb[57].mxu1  ;;  %v1423_v59 = vadd.f32 %v2328_v18, %v1050_v53  ;;  %v1455_v60 = vadd.f32 %v2328_v18, %v1178_v54 }
 0x194   : > { %v1053_v57 = vpop.f32.mrb[58].mxu0  ;;  %v1181_v58 = vpop.f32.mrb[58].mxu1 }
 0x195   : > { %v1055_v61 = vpop.f32.mrb[59].mxu0  ;;  %v1183_v62 = vpop.f32.mrb[59].mxu1  ;;  %v1487_v63 = vmax.f32 %v1423_v59, 0.0  ;;  %v1519_v0 = vmax.f32 %v1455_v60, 0.0  ;;  %v1424_v1 = vadd.f32 %v2328_v18, %v1053_v57  ;;  %v1456_v2 = vadd.f32 %v2328_v18, %v1181_v58 }
 0x197   : > { %1551 = vst [vmem:[%s2336_s19 + $0xe0] sm:$0xff] %v1487_v63  ;;  %1583 = vst [vmem:[%s2336_s19 + $0x1e0] sm:$0xff] %v1519_v0  ;;  %v1488_v3 = vmax.f32 %v1424_v1, 0.0  ;;  %v1520_v4 = vmax.f32 %v1456_v2, 0.0 }
 0x199   : > { %1552 = vst [vmem:[%s2336_s19 + $0xe8] sm:$0xff] %v1488_v3  ;;  %1584 = vst [vmem:[%s2336_s19 + $0x1e8] sm:$0xff] %v1520_v4 }
 0x19a   : > { %v1058_v5 = vpop.f32.mrb[60].mxu0  ;;  %v1186_v6 = vpop.f32.mrb[60].mxu1 }
 0x19b   : > { %v1060_v7 = vpop.f32.mrb[61].mxu0  ;;  %v1188_v8 = vpop.f32.mrb[61].mxu1  ;;  %v1425_v11 = vadd.f32 %v2328_v18, %v1058_v5  ;;  %v1457_v12 = vadd.f32 %v2328_v18, %v1186_v6 }
 0x19c   : > { %v1061_v9 = vpop.f32.mrb[62].mxu0  ;;  %v1189_v10 = vpop.f32.mrb[62].mxu1 }
 0x19d   : > { %v1063_v13 = vpop.f32.mrb[63].mxu0  ;;  %v1191_v14 = vpop.f32.mrb[63].mxu1  ;;  %v1489_v15 = vmax.f32 %v1425_v11, 0.0  ;;  %v1521_v16 = vmax.f32 %v1457_v12, 0.0  ;;  %v1426_v17 = vadd.f32 %v2328_v18, %v1061_v9  ;;  %v1458_v19 = vadd.f32 %v2328_v18, %v1189_v10 }
 0x19f   : > { %1553 = vst [vmem:[%s2336_s19 + $0xf0] sm:$0xff] %v1489_v15  ;;  %1585 = vst [vmem:[%s2336_s19 + $0x1f0] sm:$0xff] %v1521_v16  ;;  %v1490_v20 = vmax.f32 %v1426_v17, 0.0  ;;  %v1522_v21 = vmax.f32 %v1458_v19, 0.0 }
 0x1a1   : > { %1554 = vst [vmem:[%s2336_s19 + $0xf8] sm:$0xff] %v1490_v20  ;;  %1586 = vst [vmem:[%s2336_s19 + $0x1f8] sm:$0xff] %v1522_v21 }
 0x1a2   : > { %2028 = shalt.err (!%p2025_p5)
}
 0x1a3   : > { %s2029_s27 = scalar_lea.hbm %s2463_s11, 8192  ;;  %s2033_s30 = scalar_lea.hbm %s2522_s3, 16384 }
 0x1a4   : > { %p2030_p6 = scmp.ne.s32.totalorder %s2463_s11, %s2029_s27  ;;  %p2034_p10 = scmp.lt.u32.totalorder %s2463_s11, %s2522_s3 }
 0x1a5   : > { %p2035_p11 = scmp.lt.u32.totalorder %s2033_s30, %s2029_s27  ;;  %p2037_p13 = scmp.lt.u32.totalorder %s2029_s27, %s2463_s11 }
 0x1a6   : > { %p2031_p7 = pnand %p2030_p6, %p2159_p4 }
 0x1a7   : > { %p2036_p12 = por %p2035_p11, %p2034_p10 }
 0x1a8   : > { %p2032_p9 = pneg %p2031_p7 }
 0x1a9   : > { %p2038_p0 = por %p2037_p13, %p2036_p12 }
 0x1ab   : > { %p2039_p1 = pnand %p2038_p0, %p2032_p9 }
 0x1ad   : > { %2042 = shalt.err (!%p2039_p1)
}
 0x1ae   : > { %s2097_s6 = smov 128   ;;  %s2098_s19 = smov 8  }
 0x1af   : > { %1844 = dma.vmem_to_hbm [thread:$0]  (%p2159_p4), %s2465_s8, 8192, %s2463_s11, %s2473_s15, %s2097_s6, %s2097_s6, %s2098_s19  }
 0x1b0 PF: > { %p1850_p2 = scmp.ge.s32.totalorder %s2093_s17, 2  ;;  %s1617_s7 = sand.u32 1, %s2073_s12  }
 0x1b1   : > { %s1618_s9 = scalar_lea.sflag [#allocation3], %s1617_s7 }
 0x1b2   : > { %p1847_p3 = pnand %p1850_p2, %p2166_p8 }
 0x1b4   : > { %2068 = dma.done.wait (!%p1847_p3), %s1618_s9, 8192  }
 0x1b5   : > { %2070 = vsyncadd (!%p1847_p3), %s1618_s9, 4294959104  ;;  %s16_s17 = sadd.s32 1, %s2093_s17   ;;  %s2525_s12 = smov %s2077_s13 }
 0x1b6   : > { %p13_p5 = scmp.ge.s32.totalorder %s16_s17, 4   ;;  %s2526_s13 = smov %s2081_s14 }
 0x1b7   : > { %s2527_s14 = smov %s2172_s25  ;;  %s2528_s15 = smov %s2089_s16 }
 0x1b8   : > { %s2529_s16 = smov %s2531_s20  ;;  %15 = sbr.rel (!%p13_p5) target bundleno = 4 (0x4), region = 81 }
 0x1bf   :  { %1623 = vsyncpa [#allocation3], 1 }
 0x1c0   :  { %1625 = vsyncpa [#allocation3 + $0x1], 1 }

</bundles_post_ra>
